<compile_context>
chip_gen: v7x
topology: tpu7x:2x2x1
jax: 0.10.0
libtpu: 0.0.40
codegen_flags: <defaults>
</compile_context>

<pallas_src>
import functools

import jax
import jax.numpy as jnp
from jax import lax
from jax.experimental import pallas as pl
from jax.experimental.pallas import tpu as pltpu


# ---------------------------------------------------------------------------
# Kernel A: fused 1x1 "head" convs (proj / k offset convs / attention+softmax)
# ---------------------------------------------------------------------------
def _head_kernel(w_ref, b_ref, x_ref, proj_ref, flow_ref, att_ref):
    # w_ref: (C_tot, C_in) resident, b_ref: (C_tot, 1) resident
    # x_ref: (1, C_in, T)   T = spatial tile, lane-dense
    x = x_ref[0].astype(jnp.float32)                  # (C_in, T)
    w = w_ref[...]
    b = b_ref[...]
    c_in = x.shape[0]

    # C_in-term broadcast-FMA on the VPU (no MXU for tiny channel counts).
    acc = b + w[:, 0:1] * x[0:1, :]                   # (C_tot, T)
    for ci in range(1, c_in):
        acc = acc + w[:, ci:ci + 1] * x[ci:ci + 1, :]

    out_ch = proj_ref.shape[1]
    two_k = flow_ref.shape[1]

    proj_ref[0] = acc[:out_ch, :].astype(proj_ref.dtype)
    flow_ref[0] = acc[out_ch:out_ch + two_k, :].astype(flow_ref.dtype)

    # Softmax over the k attention channels (small sublane-axis reduction).
    logits = acc[out_ch + two_k:, :]
    m = jnp.max(logits, axis=0, keepdims=True)
    e = jnp.exp(logits - m)
    att_ref[0] = (e / jnp.sum(e, axis=0, keepdims=True)).astype(att_ref.dtype)


# ---------------------------------------------------------------------------
# Kernel B: deformable bilinear aggregation + residual + BN + final 1x1 conv
# ---------------------------------------------------------------------------
def _deform_kernel(proj_ref, flow_ref, att_ref, base_ref, bn_scale_ref,
                   bn_shift_ref, w_out_ref, b_out_ref, o_ref, *, height, width):
    hw = height * width
    proj = proj_ref[0].astype(jnp.float32)            # (out_ch, HW)
    flows = flow_ref[0].astype(jnp.float32)           # (2k,    HW)
    att = att_ref[0].astype(jnp.float32)              # (k,     HW)
    base = base_ref[...]                              # (2, HW): row0=x, row1=y
    bx = base[0:1, :]
    by = base[1:2, :]

    k = att.shape[0]
    out_ch = proj.shape[0]

    # Source pixel id along sublanes of the one-hot bilinear matrix.
    q_rows = lax.broadcasted_iota(jnp.int32, (hw, hw), 0).astype(jnp.float32)

    feat = jnp.zeros_like(proj)                       # (out_ch, HW)
    for j in range(k):
        fx = flows[2 * j:2 * j + 1, :]                # (1, HW)
        fy = flows[2 * j + 1:2 * j + 2, :]
        # align_corners=True cancels the 2*v/(dim-1)-1 normalisation exactly.
        xs = bx + fx
        ys = by + fy
        x0 = jnp.floor(xs)
        y0 = jnp.floor(ys)
        tx = xs - x0
        ty = ys - y0

        # TODO(synk): one-hot bilinear matrix is O(HW^2) VMEM; fine for small
        # feature maps, a DMA-gather formulation is needed for large H*W.
        m_oh = jnp.zeros((hw, hw), jnp.float32)
        for dx, dy in ((0, 0), (1, 0), (0, 1), (1, 1)):
            cx = x0 + dx
            cy = y0 + dy
            wgt = (tx if dx else 1.0 - tx) * (ty if dy else 1.0 - ty)
            valid = ((cx >= 0.0) & (cx <= width - 1.0)
                     & (cy >= 0.0) & (cy <= height - 1.0))
            wgt = jnp.where(valid, wgt, 0.0)          # padding_mode='zeros'
            q_c = cy * width + cx                     # integer-valued f32
            m_oh = m_oh + jnp.where(q_rows == q_c, wgt, 0.0)

        # gather-as-matmul on the MXU: (out_ch, HW_src) @ (HW_src, HW_dst)
        samp = jnp.dot(proj, m_oh, preferred_element_type=jnp.float32)
        # repeat_interleave(att, out_ch) * cat(feats) then group-sum
        # == per-group broadcast multiply-accumulate:
        feat = feat + att[j:j + 1, :] * samp

    # TODO(synk): nn.Dropout(0.1) treated as identity (inference mode).
    pre = proj + feat

    # TODO(synk): BatchNorm2d as inference-mode affine (running stats folded
    # to scale/shift); training-mode batch statistics not implemented.
    bn = pre * bn_scale_ref[...] + bn_shift_ref[...]

    # Final 1x1 conv (out_ch -> in_ch) as a VPU broadcast-FMA.
    w_out = w_out_ref[...]                            # (in_ch, out_ch)
    acc = b_out_ref[...] + w_out[:, 0:1] * bn[0:1, :]
    for co in range(1, out_ch):
        acc = acc + w_out[:, co:co + 1] * bn[co:co + 1, :]
    o_ref[0] = acc.astype(o_ref.dtype)


# ---------------------------------------------------------------------------
# Wrapper
# ---------------------------------------------------------------------------
def dfm_att_forward(x, params):
    """DFMAtt forward.  x: (N, C_in, H, W) float32 -> (N, C_in, H, W)."""
    n, c_in, h, w = x.shape
    hw = h * w
    assert hw % 128 == 0, "H*W must be a multiple of 128 (TPU lane width)"

    out_ch = params["w_proj"].shape[0]
    k = len(params["w_off"])
    c_tot = out_ch + 2 * k + k
    f32 = jnp.float32

    # Fold / fuse parameters once (tiny; stays resident in VMEM).
    w_all = jnp.concatenate(
        [params["w_proj"].reshape(out_ch, c_in)]
        + [wo.reshape(2, c_in) for wo in params["w_off"]]
        + [params["w_att"].reshape(k, c_in)], axis=0).astype(f32)
    b_all = jnp.concatenate(
        [params["b_proj"]] + list(params["b_off"]) + [params["b_att"]],
        axis=0).astype(f32).reshape(c_tot, 1)
    bn_scale = (params["bn_gamma"]
                / jnp.sqrt(params["bn_var"] + params["bn_eps"])).astype(f32)
    bn_shift = (params["bn_beta"].astype(f32)
                - params["bn_mean"].astype(f32) * bn_scale)
    bn_scale = bn_scale.reshape(out_ch, 1)
    bn_shift = bn_shift.reshape(out_ch, 1)
    w_out = params["w_out"].reshape(c_in, out_ch).astype(f32)
    b_out = params["b_out"].reshape(c_in, 1).astype(f32)

    # Base pixel grid (x, y) per flattened spatial index (lane-dense).
    idx = jnp.arange(hw, dtype=jnp.int32)
    base = jnp.stack([(idx % w).astype(f32), (idx // w).astype(f32)], axis=0)

    x_flat = x.reshape(n, c_in, hw)      # free reshape: native NCHW, HW lanes

    # ---- Kernel A: tiled over (batch, spatial) for pipelined DMA ----------
    tile = 128
    for m_lanes in range(min(hw // 128, 16), 0, -1):   # up to 2048 lanes/step
        if hw % (128 * m_lanes) == 0:
            tile = 128 * m_lanes
            break
    n_tiles = hw // tile

    head = pl.pallas_call(
        _head_kernel,
        out_shape=(
            jax.ShapeDtypeStruct((n, out_ch, hw), f32),
            jax.ShapeDtypeStruct((n, 2 * k, hw), f32),
            jax.ShapeDtypeStruct((n, k, hw), f32),
        ),
        grid_spec=pltpu.PrefetchScalarGridSpec(
            num_scalar_prefetch=0,
            grid=(n, n_tiles),
            in_specs=[
                pl.BlockSpec((c_tot, c_in), lambda b, t: (0, 0)),   # resident
                pl.BlockSpec((c_tot, 1), lambda b, t: (0, 0)),      # resident
                pl.BlockSpec((1, c_in, tile), lambda b, t: (b, 0, t)),
            ],
            out_specs=[
                pl.BlockSpec((1, out_ch, tile), lambda b, t: (b, 0, t)),
                pl.BlockSpec((1, 2 * k, tile), lambda b, t: (b, 0, t)),
                pl.BlockSpec((1, k, tile), lambda b, t: (b, 0, t)),
            ],
        ),
        compiler_params=pltpu.CompilerParams(
            dimension_semantics=("parallel", "parallel"),
            vmem_limit_bytes=32 * 1024 * 1024,
        ),
    )
    proj, flows, att = head(w_all, b_all, x_flat)

    # ---- Kernel B: deformable aggregation + BN + out conv, grid over batch -
    deform = pl.pallas_call(
        functools.partial(_deform_kernel, height=h, width=w),
        out_shape=jax.ShapeDtypeStruct((n, c_in, hw), x.dtype),
        grid_spec=pltpu.PrefetchScalarGridSpec(
            num_scalar_prefetch=0,
            grid=(n,),
            in_specs=[
                pl.BlockSpec((1, out_ch, hw), lambda b: (b, 0, 0)),
                pl.BlockSpec((1, 2 * k, hw), lambda b: (b, 0, 0)),
                pl.BlockSpec((1, k, hw), lambda b: (b, 0, 0)),
                pl.BlockSpec((2, hw), lambda b: (0, 0)),            # resident
                pl.BlockSpec((out_ch, 1), lambda b: (0, 0)),
                pl.BlockSpec((out_ch, 1), lambda b: (0, 0)),
                pl.BlockSpec((c_in, out_ch), lambda b: (0, 0)),
                pl.BlockSpec((c_in, 1), lambda b: (0, 0)),
            ],
            out_specs=pl.BlockSpec((1, c_in, hw), lambda b: (b, 0, 0)),
        ),
        compiler_params=pltpu.CompilerParams(
            dimension_semantics=("parallel",),
            vmem_limit_bytes=32 * 1024 * 1024,
        ),
    )
    out_flat = deform(proj, flows, att, base, bn_scale, bn_shift, w_out, b_out)

    return out_flat.reshape(n, c_in, h, w)


# ---------------------------------------------------------------------------
# Plain-JAX reference (mirrors the PyTorch forward in eval mode)
# ---------------------------------------------------------------------------
def _ref_forward(x, params):
    n, c_in, h, w = x.shape
    out_ch = params["w_proj"].shape[0]
    k = len(params["w_off"])

    def conv1x1(inp, wt, bs):
        return (jnp.einsum("nchw,oc->nohw", inp, wt[:, :, 0, 0])
                + bs[None, :, None, None])

    proj = conv1x1(x, params["w_proj"], params["b_proj"])
    att = jax.nn.softmax(conv1x1(x, params["w_att"], params["b_att"]), axis=1)

    gy, gx = jnp.meshgrid(jnp.arange(h), jnp.arange(w), indexing="ij")
    gx = gx.astype(jnp.float32)[None]
    gy = gy.astype(jnp.float32)[None]
    proj_flat = proj.reshape(n, out_ch, h * w)

    feat_sum = jnp.zeros_like(proj)
    for j in range(k):
        flow = conv1x1(x, params["w_off"][j], params["b_off"][j])
        xs = gx + flow[:, 0]
        ys = gy + flow[:, 1]
        x0 = jnp.floor(xs)
        y0 = jnp.floor(ys)
        tx = xs - x0
        ty = ys - y0
        samp = jnp.zeros((n, out_ch, h, w), jnp.float32)
        for dx, dy in ((0, 0), (1, 0), (0, 1), (1, 1)):
            cx = x0 + dx
            cy = y0 + dy
            wgt = (tx if dx else 1.0 - tx) * (ty if dy else 1.0 - ty)
            valid = (cx >= 0) & (cx <= w - 1) & (cy >= 0) & (cy <= h - 1)
            wgt = jnp.where(valid, wgt, 0.0)
            cxi = jnp.clip(cx, 0, w - 1).astype(jnp.int32)
            cyi = jnp.clip(cy, 0, h - 1).astype(jnp.int32)
            q = (cyi * w + cxi).reshape(n, 1, h * w)
            vals = jnp.take_along_axis(
                proj_flat, jnp.broadcast_to(q, (n, out_ch, h * w)), axis=2)
            samp = samp + wgt[:, None] * vals.reshape(n, out_ch, h, w)
        feat_sum = feat_sum + att[:, j:j + 1] * samp

    pre = proj + feat_sum                          # dropout == identity (eval)
    scale = params["bn_gamma"] / jnp.sqrt(params["bn_var"] + params["bn_eps"])
    shift = params["bn_beta"] - params["bn_mean"] * scale
    bn = pre * scale[None, :, None, None] + shift[None, :, None, None]
    return conv1x1(bn, params["w_out"], params["b_out"])


if __name__ == "__main__":
    key = jax.random.PRNGKey(0)
    keys = iter(jax.random.split(key, 32))

    def nrm(shape, scale=1.0):
        return scale * jax.random.normal(next(keys), shape, dtype=jnp.float32)

    n, c_in, out_ch, k, h, w = 2, 4, 3, 2, 16, 16

    params = {
        "w_proj": nrm((out_ch, c_in, 1, 1), 0.3),
        "b_proj": nrm((out_ch,), 0.1),
        "w_off": [nrm((2, c_in, 1, 1), 0.7) for _ in range(k)],
        "b_off": [nrm((2,), 0.3) for _ in range(k)],
        "w_att": nrm((k, c_in, 1, 1), 0.5),
        "b_att": nrm((k,), 0.1),
        "bn_gamma": 1.0 + nrm((out_ch,), 0.1),
        "bn_beta": nrm((out_ch,), 0.1),
        "bn_mean": nrm((out_ch,), 0.1),
        "bn_var": jax.random.uniform(next(keys), (out_ch,), dtype=jnp.float32,
                                     minval=0.5, maxval=1.5),
        "bn_eps": 1e-5,
        "w_out": nrm((c_in, out_ch, 1, 1), 0.3),
        "b_out": nrm((c_in,), 0.1),
    }
    x = nrm((n, c_in, h, w), 1.0)

    out = dfm_att_forward(x, params)
    jax.block_until_ready(out)

    ref = _ref_forward(x, params)
    assert out.shape == (n, c_in, h, w)
    err = float(jnp.max(jnp.abs(out - ref)))
    # Tolerance covers possible reduced-precision MXU passes in the one-hot
    # gather matmul; the remaining math is exact f32 VPU work.
    assert err < 5e-3, f"max abs err {err}"

    print("KERNEL_OK")
</pallas_src>

<mosaic_0001>
module attributes {stable_mosaic.version = 11 : i64} {
  func.func @_head_kernel(%arg0: i32, %arg1: i32, %arg2: memref<9x4xf32, #tpu.memory_space<vmem>>, %arg3: memref<9x1xf32, #tpu.memory_space<vmem>>, %arg4: memref<1x4x256xf32, #tpu.memory_space<vmem>>, %arg5: memref<1x3x256xf32, #tpu.memory_space<vmem>>, %arg6: memref<1x4x256xf32, #tpu.memory_space<vmem>>, %arg7: memref<1x2x256xf32, #tpu.memory_space<vmem>>) attributes {dimension_semantics = [#tpu.dimension_semantics<parallel>, #tpu.dimension_semantics<parallel>], iteration_bounds = array<i64: 2, 1>, scalar_prefetch = 0 : i64, scratch_operands = 0 : i64, tpu.core_type = #tpu.core_type<tc>, window_params = [{pipeline_mode = #tpu.pipeline_mode<synchronous>, transform_indices = @transform_0, window_bounds = array<i64: 9, 4>}, {pipeline_mode = #tpu.pipeline_mode<synchronous>, transform_indices = @transform_1, window_bounds = array<i64: 9, 1>}, {transform_indices = @transform_2, window_bounds = array<i64: 1, 4, 256>}, {transform_indices = @transform_3, window_bounds = array<i64: 1, 3, 256>}, {transform_indices = @transform_4, window_bounds = array<i64: 1, 4, 256>}, {transform_indices = @transform_5, window_bounds = array<i64: 1, 2, 256>}]} {
    %c0 = arith.constant 0 : index
    %c0_0 = arith.constant 0 : index
    %c0_1 = arith.constant 0 : index
    %0 = vector.load %arg4[%c0, %c0_0, %c0_1] : memref<1x4x256xf32, #tpu.memory_space<vmem>>, vector<1x4x256xf32>
    %1 = vector.shape_cast %0 : vector<1x4x256xf32> to vector<4x256xf32>
    %c0_2 = arith.constant 0 : index
    %c0_3 = arith.constant 0 : index
    %2 = vector.load %arg2[%c0_2, %c0_3] : memref<9x4xf32, #tpu.memory_space<vmem>>, vector<9x4xf32>
    %c0_4 = arith.constant 0 : index
    %c0_5 = arith.constant 0 : index
    %3 = vector.load %arg3[%c0_4, %c0_5] : memref<9x1xf32, #tpu.memory_space<vmem>>, vector<9x1xf32>
    %4 = vector.extract_strided_slice %2 {offsets = [0, 0], sizes = [9, 1], strides = [1, 1]} : vector<9x4xf32> to vector<9x1xf32>
    %5 = vector.extract_strided_slice %1 {offsets = [0, 0], sizes = [1, 256], strides = [1, 1]} : vector<4x256xf32> to vector<1x256xf32>
    %6 = vector.broadcast %4 : vector<9x1xf32> to vector<9x256xf32>
    %7 = vector.broadcast %5 : vector<1x256xf32> to vector<9x256xf32>
    %8 = arith.mulf %6, %7 : vector<9x256xf32>
    %9 = vector.broadcast %3 : vector<9x1xf32> to vector<9x256xf32>
    %10 = arith.addf %9, %8 : vector<9x256xf32>
    %11 = vector.extract_strided_slice %2 {offsets = [0, 1], sizes = [9, 1], strides = [1, 1]} : vector<9x4xf32> to vector<9x1xf32>
    %12 = vector.extract_strided_slice %1 {offsets = [1, 0], sizes = [1, 256], strides = [1, 1]} : vector<4x256xf32> to vector<1x256xf32>
    %13 = vector.broadcast %11 : vector<9x1xf32> to vector<9x256xf32>
    %14 = vector.broadcast %12 : vector<1x256xf32> to vector<9x256xf32>
    %15 = arith.mulf %13, %14 : vector<9x256xf32>
    %16 = arith.addf %10, %15 : vector<9x256xf32>
    %17 = vector.extract_strided_slice %2 {offsets = [0, 2], sizes = [9, 1], strides = [1, 1]} : vector<9x4xf32> to vector<9x1xf32>
    %18 = vector.extract_strided_slice %1 {offsets = [2, 0], sizes = [1, 256], strides = [1, 1]} : vector<4x256xf32> to vector<1x256xf32>
    %19 = vector.broadcast %17 : vector<9x1xf32> to vector<9x256xf32>
    %20 = vector.broadcast %18 : vector<1x256xf32> to vector<9x256xf32>
    %21 = arith.mulf %19, %20 : vector<9x256xf32>
    %22 = arith.addf %16, %21 : vector<9x256xf32>
    %23 = vector.extract_strided_slice %2 {offsets = [0, 3], sizes = [9, 1], strides = [1, 1]} : vector<9x4xf32> to vector<9x1xf32>
    %24 = vector.extract_strided_slice %1 {offsets = [3, 0], sizes = [1, 256], strides = [1, 1]} : vector<4x256xf32> to vector<1x256xf32>
    %25 = vector.broadcast %23 : vector<9x1xf32> to vector<9x256xf32>
    %26 = vector.broadcast %24 : vector<1x256xf32> to vector<9x256xf32>
    %27 = arith.mulf %25, %26 : vector<9x256xf32>
    %28 = arith.addf %22, %27 : vector<9x256xf32>
    %29 = vector.extract_strided_slice %28 {offsets = [0, 0], sizes = [3, 256], strides = [1, 1]} : vector<9x256xf32> to vector<3x256xf32>
    %c0_6 = arith.constant 0 : index
    %c0_7 = arith.constant 0 : index
    %c0_8 = arith.constant 0 : index
    %30 = vector.load %arg5[%c0_6, %c0_7, %c0_8] : memref<1x3x256xf32, #tpu.memory_space<vmem>>, vector<1x3x256xf32>
    %31 = vector.shape_cast %30 : vector<1x3x256xf32> to vector<3x256xf32>
    %32 = vector.shape_cast %29 : vector<3x256xf32> to vector<1x3x256xf32>
    tpu.vector_store %arg5[%c0_6, %c0_7, %c0_8], %32 {strides = array<i32>} : memref<1x3x256xf32, #tpu.memory_space<vmem>>, vector<1x3x256xf32>,
    %33 = vector.extract_strided_slice %28 {offsets = [3, 0], sizes = [4, 256], strides = [1, 1]} : vector<9x256xf32> to vector<4x256xf32>
    %c0_9 = arith.constant 0 : index
    %c0_10 = arith.constant 0 : index
    %c0_11 = arith.constant 0 : index
    %34 = vector.load %arg6[%c0_9, %c0_10, %c0_11] : memref<1x4x256xf32, #tpu.memory_space<vmem>>, vector<1x4x256xf32>
    %35 = vector.shape_cast %34 : vector<1x4x256xf32> to vector<4x256xf32>
    %36 = vector.shape_cast %33 : vector<4x256xf32> to vector<1x4x256xf32>
    tpu.vector_store %arg6[%c0_9, %c0_10, %c0_11], %36 {strides = array<i32>} : memref<1x4x256xf32, #tpu.memory_space<vmem>>, vector<1x4x256xf32>,
    %37 = vector.extract_strided_slice %28 {offsets = [7, 0], sizes = [2, 256], strides = [1, 1]} : vector<9x256xf32> to vector<2x256xf32>
    %cst = arith.constant dense<0xFF800000> : vector<256xf32>
    %38 = vector.multi_reduction <maximumf>, %37, %cst [0] : vector<2x256xf32> to vector<256xf32>
    %39 = vector.shape_cast %38 : vector<256xf32> to vector<1x256xf32>
    %40 = vector.broadcast %39 : vector<1x256xf32> to vector<2x256xf32>
    %41 = arith.subf %37, %40 : vector<2x256xf32>
    %42 = math.exp %41 : vector<2x256xf32>
    %cst_12 = arith.constant dense<0.000000e+00> : vector<256xf32>
    %43 = vector.multi_reduction <add>, %42, %cst_12 [0] : vector<2x256xf32> to vector<256xf32>
    %44 = vector.shape_cast %43 : vector<256xf32> to vector<1x256xf32>
    %45 = vector.broadcast %44 : vector<1x256xf32> to vector<2x256xf32>
    %46 = arith.divf %42, %45 : vector<2x256xf32>
    %c0_13 = arith.constant 0 : index
    %c0_14 = arith.constant 0 : index
    %c0_15 = arith.constant 0 : index
    %47 = vector.load %arg7[%c0_13, %c0_14, %c0_15] : memref<1x2x256xf32, #tpu.memory_space<vmem>>, vector<1x2x256xf32>
    %48 = vector.shape_cast %47 : vector<1x2x256xf32> to vector<2x256xf32>
    %49 = vector.shape_cast %46 : vector<2x256xf32> to vector<1x2x256xf32>
    tpu.vector_store %arg7[%c0_13, %c0_14, %c0_15], %49 {strides = array<i32>} : memref<1x2x256xf32, #tpu.memory_space<vmem>>, vector<1x2x256xf32>,
    return
  }
  func.func @transform_0(%arg0: i32, %arg1: i32) -> (i32, i32) {
    %c0_i32 = arith.constant 0 : i32
    %c0_i32_0 = arith.constant 0 : i32
    %c0_i32_1 = arith.constant 0 : i32
    return %c0_i32, %c0_i32_0 : i32, i32
  }
  func.func @transform_1(%arg0: i32, %arg1: i32) -> (i32, i32) {
    %c0_i32 = arith.constant 0 : i32
    %c0_i32_0 = arith.constant 0 : i32
    %c0_i32_1 = arith.constant 0 : i32
    return %c0_i32, %c0_i32_0 : i32, i32
  }
  func.func @transform_2(%arg0: i32, %arg1: i32) -> (i32, i32, i32) {
    %c0_i32 = arith.constant 0 : i32
    %c0_i32_0 = arith.constant 0 : i32
    return %arg0, %c0_i32, %arg1 : i32, i32, i32
  }
  func.func @transform_3(%arg0: i32, %arg1: i32) -> (i32, i32, i32) {
    %c0_i32 = arith.constant 0 : i32
    %c0_i32_0 = arith.constant 0 : i32
    return %arg0, %c0_i32, %arg1 : i32, i32, i32
  }
  func.func @transform_4(%arg0: i32, %arg1: i32) -> (i32, i32, i32) {
    %c0_i32 = arith.constant 0 : i32
    %c0_i32_0 = arith.constant 0 : i32
    return %arg0, %c0_i32, %arg1 : i32, i32, i32
  }
  func.func @transform_5(%arg0: i32, %arg1: i32) -> (i32, i32, i32) {
    %c0_i32 = arith.constant 0 : i32
    %c0_i32_0 = arith.constant 0 : i32
    return %arg0, %c0_i32, %arg1 : i32, i32, i32
  }
}

</mosaic_0001>

<bundles_post_ra>
// kernel: tpu_custom_call.1
= control target key start
LH: loop header
LB: loop body
LE: loop exit
PB: predicated region body
PF: predicated region fallthrough
CT: control target
= control target key end

     0   :  { %11 = vsyncpa [#allocation3], 0  ;;  %s1214_s0 = inlined_call_operand.vmem [shape: f32[9,4], index: 0, kind: input, shape index: {}]   ;;  %s1215_s1 = inlined_call_operand.vmem [shape: f32[9,1], index: 1, kind: input, shape index: {}]   ;;  %s1216_s2 = inlined_call_operand.vmem [shape: f32[2,4,256], index: 2, kind: input, shape index: {}]   ;;  %s1217_s3 = inlined_call_operand.vmem [shape: f32[2,3,256], index: 3, kind: output, shape index: {0}]   ;;  %s1218_s4 = inlined_call_operand.hbm [shape: f32[2,4,256], index: 4, kind: output, shape index: {1}]   ;;  %s1219_s5 = inlined_call_operand.hbm [shape: f32[2,2,256], index: 5, kind: output, shape index: {2}]  }
   0x1   :  { %13 = vsyncpa [#allocation3 + $0x1], 0 }
   0x2   :  { %14 = vsyncpa [#allocation5], 0 }
   0x3   :  { %16 = vsyncpa [#allocation5 + $0x1], 0  ;;  %s1014_s18 = smov 0   ;;  %s1016_s19 = smov 0  }
   0x4   :  { %s1018_s20 = smov 0   ;;  %s1020_s21 = smov 0  }
   0x5   :  { %s1022_s22 = smov 0   ;;  %s1024_s23 = smov 0  }
   0x6 LB: > { %s755_s24 = sadd.s32 4294967295, %s975_s23   ;;  %s756_s25 = sadd.s32 4294967294, %s975_s23   ;;  %s975_s23 = sphi %s1024_s23, %s22_s23   ;;  %s971_s22 = sphi %s1022_s22, %s1226_s22   ;;  %s967_s21 = sphi %s1020_s21, %s1225_s21   ;;  %s963_s20 = sphi %s1018_s20, %s1224_s20   ;;  %s959_s19 = sphi %s1016_s19, %s1223_s19   ;;  %s955_s18 = sphi %s1014_s18, %s1222_s18  }
   0x7   : > { %s34_s26 = sadd.s32 1, %s971_s22  ;;  %s141_s27 = sadd.s32 1, %s963_s20 }
   0x8   : > { %p36_p0 = scmp.ge.s32.totalorder %s34_s26, 2  ;;  %p151_p1 = scmp.ne.s32.totalorder %s963_s20, %s959_s19 }
   0x9   : > { %p152_p2 = scmp.eq.s32.totalorder %s755_s24, 1  ;;  %p157_p3 = scmp.ne.s32.totalorder %s959_s19, %s955_s18 }
   0xa   : > { %s1228_s26 = smov (%p36_p0, %s34_s26), 0  ;;  %p158_p5 = scmp.eq.s32.totalorder %s756_s25, 1 }
   0xb   : > { %p1054_p4 = por %p152_p2, %p151_p1  ;;  %s136_s29 = ssub.s32 %s971_s22, %s1228_s26 }
   0xc   : > { %p759_p6 = scmp.ge.s32.totalorder %s975_s23, 1  ;;  %p139_p7 = scmp.eq.s32.totalorder %s136_s29, 0 }
   0xd   : > { %p1061_p8 = por %p158_p5, %p157_p3  ;;  %p223_p9 = scmp.lt.s32.totalorder %s975_s23, 3 }
   0xe   : > { %s1067_s6 = scalar_select %p139_p7, %s963_s20, %s141_s27  }
   0xf   : > { %p224_p10 = pnand %p759_p6, %p223_p9 }
  0x10   : > { %v294_v0 = vld [vmem:[%s1215_s1] sm:$0xff] (!%p224_p10)  ;;  %v977_v2 = vmov (!%p224_p10), 0   ;;  %v295_v3 = vld [vmem:[%s1215_s1 + $0x8] sm:$0x1] (!%p224_p10)  ;;  %v978_v5 = vmov (!%p224_p10), 1   ;;  %v979_v6 = vmov (!%p224_p10), 2   ;;  %v307_v8 = vlaneseq (!%p224_p10) }
  0x11   : > { %227 = sbr.rel (%p224_p10) target bundleno = 269 (0x10d), region = 32  ;;  %v292_v1 = vld [vmem:[%s1214_s0] sm:$0xff] (!%p224_p10)  ;;  %846 = vset.pattern.permute.xlu1 (!%p224_p10), %v977_v2  ;;  %845 = vset.pattern.permute.xlu0 (!%p224_p10), %v977_v2  ;;  %v293_v4 = vld [vmem:[%s1214_s0 + $0x8] sm:$0x1] (!%p224_p10)  ;;  %v980_v7 = vmov (!%p224_p10), 3   ;;  %p270_p11 = scmp.lt.s32.totalorder (!%p224_p10), %s967_s21, 1 }
  0x12   : > { %331 = vperm.xlu1 (!%p224_p10), %846, %v294_v0   ;;  %298 = vperm.xlu0 (!%p224_p10), %845, %v292_v1   ;;  %v1086_v9 = vshrl.u32 (!%p224_p10), %v307_v8, 7  ;;  %s1102_s27 = sand.u32 (!%p224_p10), 1, %s959_s19   ;;  %vm451_vm0 = vcmask (!%p224_p10), 1040384   ;;  %vm452_vm1 = vcmask (!%p224_p10), 1044484   ;;  %vm460_vm2 = vcmask (!%p224_p10), 1047559   ;;  %s778_s10 = sshll.u32 (!%p224_p10), %s967_s21, 7 }
  0x13   : > { %s760_s29 = sshll.u32 (!%p224_p10), %s1102_s27, 3  ;;  %vm453_vm3 = vmor (!%p224_p10), %vm451_vm0, %vm452_vm1  ;;  %s981_s24 = smov (!%p224_p10), [#allocation2]  }
  0x14   : > { %v309_v11 = vsub.s32 (!%p224_p10), 0, %v1086_v9  ;;  %v313_v12 = vsub.s32 (!%p224_p10), 4, %v1086_v9  ;;  %v353_v15 = vsub.s32 (!%p224_p10), 1, %v1086_v9  ;;  %v357_v16 = vsub.s32 (!%p224_p10), 5, %v1086_v9  ;;  %s261_s11 = scalar_lea.vmem (!%p224_p10), [#allocation2], %s760_s29 }
  0x15   : > { %v387_v21 = vsub.s32 (!%p224_p10), 2, %v1086_v9  ;;  %v391_v22 = vsub.s32 (!%p224_p10), 6, %v1086_v9  ;;  %v421_v25 = vsub.s32 (!%p224_p10), 3, %v1086_v9  ;;  %v425_v26 = vsub.s32 (!%p224_p10), 7, %v1086_v9  ;;  %s591_s12 = sshll.u32 (!%p224_p10), %s261_s11, 4  ;;  %s1130_s12 = int_to_ptr.vmem [resolvable:$true] %s591_s12 }
  0x16   : > { %336 = vperm.xlu1 (!%p224_p10), %846, %v295_v3   ;;  %303 = vperm.xlu0 (!%p224_p10), %845, %v293_v4   ;;  %s865_s17 = scalar_lea.vmem (!%p224_p10), %s1130_s12, 128 }
  0x17   : > { %p866_p12 = scmp.ne.s32.totalorder (!%p224_p10), %s1130_s12, %s865_s17 }
  0x18   : > { %s1083_s15 = scalar_select %p270_p11, %s967_s21, 1 }
  0x19   : > { %p867_p13 = pnand %p866_p12, %p1054_p4 }
  0x1a   : > { %848 = vset.pattern.permute.xlu1 %v978_v5  ;;  %847 = vset.pattern.permute.xlu0 %v978_v5  ;;  %s776_s16 = sshll.u32 %s1083_s15, 3  ;;  %s1128_s15 = scalar_lea.hbm %s1218_s4, %s778_s10 }
  0x1b   : > { %348 = vperm.xlu1 %848, %v293_v4   ;;  %344 = vperm.xlu0 %847, %v292_v1   ;;  %s277_s25 = scalar_lea.vmem %s1216_s2, %s776_s16  ;;  %s287_s9 = scalar_lea.vmem %s1217_s3, %s776_s16 }
  0x1c   : > { %v291_v14 = vld [vmem:[%s277_s25] sm:$0xff]  ;;  %s566_s16 = scalar_lea.sflag [#allocation3], %s1102_s27  ;;  %p868_p0 = pneg %p867_p13 }
  0x1d   : > { %v310_v17 = vrot.slane %v291_v14, %v309_v11  ;;  %v314_v18 = vrot.slane %v291_v14, %v313_v12  ;;  %v354_v23 = vrot.slane %v291_v14, %v353_v15  ;;  %v358_v24 = vrot.slane %v291_v14, %v357_v16  ;;  %s869_s25 = sshll.u32 %s981_s24, 4  ;;  %s870_s25 = int_to_ptr.vmem [resolvable:$false] %s869_s25 }
  0x1e   : > { %v388_v29 = vrot.slane %v291_v14, %v387_v21  ;;  %v392_v30 = vrot.slane %v291_v14, %v391_v22  ;;  %v422_v35 = vrot.slane %v291_v14, %v421_v25  ;;  %v426_v36 = vrot.slane %v291_v14, %v425_v26  ;;  %s871_s29 = scalar_lea.vmem %s870_s25, 256  ;;  %p872_p1 = scmp.lt.s32.totalorder %s1130_s12, %s870_s25 }
  0x1f   : > { %849 = vset.pattern.permute.xlu1 %v979_v6  ;;  %850 = vset.pattern.permute.xlu0 %v979_v6  ;;  %v320_v27 = vrot.slane %v310_v17, %v309_v11  ;;  %v324_v28 = vrot.slane %v314_v18, %v309_v11  ;;  %v364_v32 = vrot.slane %v354_v23, %v353_v15  ;;  %p873_p2 = scmp.lt.s32.totalorder %s871_s29, %s865_s17 }
  0x20   : > { %378 = vperm.xlu1 %849, %v292_v1   ;;  %382 = vperm.xlu0 %850, %v293_v4   ;;  %v368_v33 = vrot.slane %v358_v24, %v353_v15  ;;  %v398_v39 = vrot.slane %v388_v29, %v387_v21  ;;  %v402_v40 = vrot.slane %v392_v30, %v387_v21 }
  0x21   : > { %v432_v46 = vrot.slane %v422_v35, %v421_v25  ;;  %v436_v47 = vrot.slane %v426_v36, %v421_v25  ;;  %p874_p3 = por %p873_p2, %p872_p1 }
  0x23   : > { %p875_p5 = pnand %p874_p3, %p868_p0 }
  0x24   : > { %851 = vset.pattern.permute.xlu1 %v980_v7  ;;  %852 = vset.pattern.permute.xlu0 %v980_v7 }
  0x25   : > { %412 = vperm.xlu1 %851, %v292_v1  }
  0x29   : > { %416 = vperm.xlu1 %851, %v293_v4  }
  0x91   : > { %v332_v10 = vpop.permute.xlu1 %331  ;;  %v299_v13 = vpop.permute.xlu0 %298 }
  0x92   : > { %v325_v37 = vmul.f32 %v320_v27, %v299_v13  ;;  %v326_v38 = vmul.f32 %v324_v28, %v299_v13 }
  0x94   : > { %v339_v48 = vadd.f32 %v332_v10, %v325_v37  ;;  %v340_v49 = vadd.f32 %v332_v10, %v326_v38 }
  0x95   : > { %v337_v19 = vpop.permute.xlu1 %336  ;;  %v304_v20 = vpop.permute.xlu0 %303 }
  0x96   : > { %v327_v44 = vmul.f32 %v320_v27, %v304_v20  ;;  %v328_v45 = vmul.f32 %v324_v28, %v304_v20 }
  0x98   : > { %v341_v57 = vadd.f32 %v337_v19, %v327_v44  ;;  %v342_v58 = vadd.f32 %v337_v19, %v328_v45 }
  0x9a   : > { %v349_v31 = vpop.permute.xlu1 %348  ;;  %v345_v34 = vpop.permute.xlu0 %344 }
  0x9b   : > { %v369_v41 = vmul.f32 %v364_v32, %v345_v34  ;;  %v370_v42 = vmul.f32 %v368_v33, %v345_v34  ;;  %v371_v53 = vmul.f32 %v364_v32, %v349_v31  ;;  %v372_v54 = vmul.f32 %v368_v33, %v349_v31 }
  0x9d   : > { %v373_v55 = vadd.f32 %v369_v41, %v339_v48  ;;  %v374_v56 = vadd.f32 %v370_v42, %v340_v49  ;;  %v375_v2 = vadd.f32 %v371_v53, %v341_v57  ;;  %v376_v3 = vadd.f32 %v372_v54, %v342_v58 }
  0x9f   : > { %v379_v43 = vpop.permute.xlu1 %378  ;;  %v383_v52 = vpop.permute.xlu0 %382 }
  0xa0   : > { %v403_v50 = vmul.f32 %v398_v39, %v379_v43  ;;  %v404_v51 = vmul.f32 %v402_v40, %v379_v43  ;;  %v405_v59 = vmul.f32 %v398_v39, %v383_v52  ;;  %v406_v60 = vmul.f32 %v402_v40, %v383_v52 }
  0xa2   : > { %v407_v62 = vadd.f32 %v403_v50, %v373_v55  ;;  %v408_v63 = vadd.f32 %v404_v51, %v374_v56  ;;  %v409_v7 = vadd.f32 %v405_v59, %v375_v2  ;;  %v410_v8 = vadd.f32 %v406_v60, %v376_v3 }
  0xa4   : > { %v413_v61 = vpop.permute.xlu1 %412 }
  0xa5   : > { %v437_v0 = vmul.f32 %v432_v46, %v413_v61  ;;  %v438_v1 = vmul.f32 %v436_v47, %v413_v61 }
  0xa7   : > { %v1105_v4 = vadd.f32 %v437_v0, %v407_v62  ;;  %v1107_v5 = vadd.f32 %v438_v1, %v408_v63 }
  0xa8   : > { %v417_v6 = vpop.permute.xlu1 %416 }
  0xa9   : > { %v439_v10 = vmul.f32 %v432_v46, %v417_v6  ;;  %v440_v11 = vmul.f32 %v436_v47, %v417_v6  ;;  %v447_v12 = vcombine.low %v1105_v4, %v1107_v5  ;;  %v450_v13 = vcombine.high %v1105_v4, %v1107_v5 }
  0xaa   : > { %v461_v18 = vsel %vm460_vm2, %v1105_v4, -inf  ;;  %v470_v20 = vsel %vm460_vm2, %v1107_v5, -inf }
  0xab   : > { %v443_v14 = vadd.f32 %v439_v10, %v409_v7  ;;  %v444_v15 = vadd.f32 %v440_v11, %v410_v8  ;;  %449 = vst [vmem:[%s287_s9] sm:$0x77] %v447_v12  ;;  %v766_v16 = vrot.slane %v447_v12, 11  ;;  %v456_v17 = vrot.slane %v450_v13, 7 }
  0xad   : > { %v462_v19 = vsel %vm451_vm0, %v443_v14, -inf  ;;  %v471_v21 = vsel %vm451_vm0, %v444_v15, -inf  ;;  %v457_v24 = vsel %vm453_vm3, %v766_v16, %v456_v17 }
  0xae   : > { %v463_v22 = vmax.f32 %v461_v18, %v462_v19  ;;  %v472_v23 = vmax.f32 %v470_v20, %v471_v21  ;;  %459 = vst [vmem:[%s261_s11] sm:$0xff] %v457_v24 }
  0xb0   : > { %v464_v25 = vrot.slane %v463_v22, 4  ;;  %v473_v26 = vrot.slane %v472_v23, 4 }
  0xb1   : > { %878 = shalt.err (!%p875_p5)
}
  0xb2   : > { %s879_s7 = scalar_lea.hbm %s1128_s15, 128  ;;  %s883_s10 = scalar_lea.hbm %s1218_s4, 256 }
  0xb3   : > { %p880_p6 = scmp.ne.s32.totalorder %s1128_s15, %s879_s7  ;;  %p884_p10 = scmp.lt.u32.totalorder %s1128_s15, %s1218_s4 }
  0xb4   : > { %p885_p11 = scmp.lt.u32.totalorder %s883_s10, %s879_s7  ;;  %p887_p13 = scmp.lt.u32.totalorder %s879_s7, %s1128_s15 }
  0xb5   : > { %p881_p7 = pnand %p880_p6, %p1054_p4 }
  0xb6   : > { %p886_p12 = por %p885_p11, %p884_p10 }
  0xb7   : > { %p882_p9 = pneg %p881_p7 }
  0xb8   : > { %p888_p0 = por %p887_p13, %p886_p12 }
  0xba   : > { %p889_p1 = pnand %p888_p0, %p882_p9 }
  0xbc   : > { %892 = shalt.err (!%p889_p1)
}
  0xbd   : > { %780 = dma.vmem_to_hbm [thread:$0]  (%p1054_p4), %s1130_s12, 128, %s1128_s15, %s566_s16   ;;  %v465_v27 = vmax.f32 %v463_v22, %v464_v25  ;;  %v474_v28 = vmax.f32 %v472_v23, %v473_v26  ;;  %vm503_vm4 = vcmask 1041408   ;;  %vm545_vm5 = vcmask 1042434  }
  0xbe   : > { %s761_s12 = sshll.u32 %s1102_s27, 2  ;;  %vm546_vm6 = vmor %vm451_vm0, %vm545_vm5  ;;  %vm548_vm8 = vcmask 1046534   ;;  %s779_s14 = sshll.u32 %s967_s21, 6 }
  0xbf   : > { %v466_v29 = vrot.slane %v465_v27, 2  ;;  %v475_v30 = vrot.slane %v474_v28, 2  ;;  %vm547_vm7 = vmor %vm546_vm6, %vm452_vm1  ;;  %s268_s15 = scalar_lea.vmem [#allocation4], %s761_s12  ;;  %s1166_s25 = scalar_lea.hbm %s1219_s5, %s779_s14 }
  0xc0   : > { %s607_s16 = sshll.u32 %s268_s15, 4  ;;  %vm549_vm9 = vmor %vm547_vm7, %vm548_vm8  ;;  %s571_s29 = scalar_lea.sflag [#allocation5], %s1102_s27  ;;  %s1168_s16 = int_to_ptr.vmem [resolvable:$true] %s607_s16 }
  0xc1   : > { %v467_v31 = vmax.f32 %v465_v27, %v466_v29  ;;  %v476_v32 = vmax.f32 %v474_v28, %v475_v30  ;;  %s893_s7 = scalar_lea.vmem %s1168_s16, 64  ;;  %s983_s21 = smov [#allocation4]  }
  0xc2   : > { %p894_p2 = scmp.ne.s32.totalorder %s1168_s16, %s893_s7  ;;  %s897_s8 = sshll.u32 %s983_s21, 4  ;;  %s898_s8 = int_to_ptr.vmem [resolvable:$false] %s897_s8 }
  0xc3   : > { %v468_v33 = vrot.slane %v467_v31, 1  ;;  %v477_v34 = vrot.slane %v476_v32, 1  ;;  %s899_s9 = scalar_lea.vmem %s898_s8, 128  ;;  %p900_p6 = scmp.lt.s32.totalorder %s1168_s16, %s898_s8 }
  0xc4   : > { %p895_p3 = pnand %p894_p2, %p1054_p4  ;;  %p901_p7 = scmp.lt.s32.totalorder %s899_s9, %s893_s7 }
  0xc5   : > { %v469_v35 = vmax.f32 %v467_v31, %v468_v33  ;;  %v478_v36 = vmax.f32 %v476_v32, %v477_v34 }
  0xc6   : > { %p896_p5 = pneg %p895_p3  ;;  %p902_p9 = por %p901_p7, %p900_p6 }
  0xc7   : > { %v479_v37 = vsub.f32 %v1105_v4, %v469_v35  ;;  %v480_v38 = vsub.f32 %v1107_v5, %v478_v36  ;;  %v481_v39 = vsub.f32 %v443_v14, %v469_v35  ;;  %v482_v40 = vsub.f32 %v444_v15, %v478_v36 }
  0xc8   : > { %v982_v5 = vmov 1983009808   ;;  %p903_p10 = pnand %p902_p9, %p896_p5 }
  0xc9   : > { %v483_v41 = vmul.f32 1.442695, %v479_v37  ;;  %v485_v42 = vmul.f32 1.442695, %v480_v38  ;;  %v487_v43 = vmul.f32 1.442695, %v481_v39  ;;  %v530_v6 = vunpack.c.l.s4 %v982_v5 }
  0xca   : > { %v489_v44 = vmul.f32 1.442695, %v482_v40 }
  0xcb   : > { %853 = vpow2.f32 %v483_v41  ;;  %v531_v7 = vunpack.c.0.s8 %v530_v6 }
  0xcc   : > { %855 = vpow2.f32 %v485_v42 }
  0xcd   : > { %857 = vpow2.f32 %v487_v43  ;;  %v534_v15 = vsub.s32 %v531_v7, %v1086_v9 }
  0xce   : > { %859 = vpow2.f32 %v489_v44 }
  0xd5   : > { %v854_v45 = vpop.eup %853 }
  0xd6   : > { %v856_v46 = vpop.eup %855  ;;  %v495_v47 = vrot.slane %v854_v45, 7 }
  0xd7   : > { %v858_v48 = vpop.eup %857  ;;  %v498_v49 = vrot.slane %v856_v46, 7 }
  0xd8   : > { %v860_v50 = vpop.eup %859  ;;  %v496_v51 = vrot.slane %v858_v48, 7 }
  0xd9   : > { %v499_v52 = vrot.slane %v860_v50, 7 }
  0xda   : > { %v497_v53 = vsel %vm451_vm0, %v495_v47, %v496_v51 }
  0xdb   : > { %v500_v54 = vsel %vm451_vm0, %v498_v49, %v499_v52  ;;  %v504_v55 = vsel %vm503_vm4, %v497_v53, 0.0 }
  0xdc   : > { %v505_v56 = vrot.slane %v504_v55, 4  ;;  %v511_v57 = vsel %vm503_vm4, %v500_v54, 0.0 }
  0xdd   : > { %v512_v58 = vrot.slane %v511_v57, 4 }
  0xde   : > { %v506_v59 = vadd.f32 %v505_v56, %v504_v55 }
  0xdf   : > { %v513_v60 = vadd.f32 %v512_v58, %v511_v57 }
  0xe0   : > { %v507_v61 = vrot.slane %v506_v59, 2 }
  0xe1   : > { %v514_v62 = vrot.slane %v513_v60, 2 }
  0xe2   : > { %v508_v63 = vadd.f32 %v507_v61, %v506_v59 }
  0xe3   : > { %v515_v0 = vadd.f32 %v514_v62, %v513_v60 }
  0xe4   : > { %v509_v1 = vrot.slane %v508_v63, 1 }
  0xe5   : > { %v516_v2 = vrot.slane %v515_v0, 1 }
  0xe6   : > { %v510_v3 = vadd.f32 %v509_v1, %v508_v63 }
  0xe7   : > { %v517_v4 = vadd.f32 %v516_v2, %v515_v0 }
  0xe8   : > { %861 = vrcp.f32 %v510_v3 }
  0xe9   : > { %863 = vrcp.f32 %v517_v4 }
  0xf2   : > { %v862_v8 = vpop.eup %861 }
  0xf3   : > { %v864_v10 = vpop.eup %863  ;;  %v519_v11 = vmul.f32 %v862_v8, %v854_v45  ;;  %v522_v12 = vmul.f32 %v862_v8, %v858_v48 }
  0xf4   : > { %v521_v13 = vmul.f32 %v864_v10, %v856_v46  ;;  %v523_v14 = vmul.f32 %v864_v10, %v860_v50 }
  0xf6   : > { %v528_v16 = vcombine.high %v519_v11, %v521_v13  ;;  %v537_v17 = vcombine.low %v522_v12, %v523_v14 }
  0xf8   : > { %v535_v18 = vrot.slane %v528_v16, %v534_v15  ;;  %v544_v19 = vrot.slane %v537_v17, %v534_v15 }
  0xfa   : > { %v536_v20 = vcombine.high %v535_v18, %v535_v18  ;;  %v552_v22 = vrot.slane %v544_v19, 7 }
  0xfc   : > { %v767_v21 = vrot.slane %v536_v20, 9 }
  0xfe   : > { %v553_v9 = vsel %vm549_vm9, %v767_v21, %v552_v22 }
  0xff   : > { %555 = vst [vmem:[%s268_s15] sm:$0xf] %v553_v9 }
 0x100   : > { %906 = shalt.err (!%p903_p10)
}
 0x101   : > { %s907_s27 = scalar_lea.hbm %s1166_s25, 64  ;;  %s911_s13 = scalar_lea.hbm %s1219_s5, 128 }
 0x102   : > { %p908_p11 = scmp.ne.s32.totalorder %s1166_s25, %s907_s27  ;;  %p912_p0 = scmp.lt.u32.totalorder %s1166_s25, %s1219_s5 }
 0x103   : > { %p913_p1 = scmp.lt.u32.totalorder %s911_s13, %s907_s27  ;;  %p915_p3 = scmp.lt.u32.totalorder %s907_s27, %s1166_s25 }
 0x104   : > { %p909_p12 = pnand %p908_p11, %p1054_p4 }
 0x105   : > { %p914_p2 = por %p913_p1, %p912_p0 }
 0x106   : > { %p910_p13 = pneg %p909_p12 }
 0x107   : > { %p916_p5 = por %p915_p3, %p914_p2 }
 0x109   : > { %p917_p6 = pnand %p916_p5, %p910_p13 }
 0x10b   : > { %920 = shalt.err (!%p917_p6)
}
 0x10c   : > { %781 = dma.vmem_to_hbm [thread:$0]  (%p1054_p4), %s1168_s16, 64, %s1166_s25, %s571_s29  }
 0x10d PF: > { %p791_p7 = scmp.ge.s32.totalorder %s975_s23, 2  ;;  %s631_s15 = sand.u32 1, %s955_s18  }
 0x10e   : > { %s632_s17 = scalar_lea.sflag [#allocation3], %s631_s15 }
 0x10f   : > { %p785_p9 = pnand %p791_p7, %p1061_p8 }
 0x111   : > { %946 = dma.done.wait (!%p785_p9), %s632_s17, 128  }
 0x112   : > { %948 = vsyncadd (!%p785_p9), %s632_s17, 4294967168  ;;  %s641_s24 = scalar_lea.sflag [#allocation5], %s631_s15 }
 0x113   : > { %950 = dma.done.wait (!%p785_p9), %s641_s24, 64  }
 0x114   : > { %952 = vsyncadd (!%p785_p9), %s641_s24, 4294967232  ;;  %s22_s23 = sadd.s32 1, %s975_s23   ;;  %s1222_s18 = smov %s959_s19 }
 0x115   : > { %p19_p10 = scmp.ge.s32.totalorder %s22_s23, 4   ;;  %s1223_s19 = smov %s963_s20 }
 0x116   : > { %s1224_s20 = smov %s1067_s6  ;;  %s1225_s21 = smov %s971_s22 }
 0x117   : > { %s1226_s22 = smov %s1228_s26  ;;  %21 = sbr.rel (!%p19_p10) target bundleno = 6 (0x6), region = 96 }
 0x11e   :  { %646 = vsyncpa [#allocation3], 1 }
 0x11f   :  { %648 = vsyncpa [#allocation3 + $0x1], 1 }
 0x120   :  { %649 = vsyncpa [#allocation5], 1 }
 0x121   :  { %651 = vsyncpa [#allocation5 + $0x1], 1 }

</bundles_post_ra>
